<compile_context>
chip_gen: v5e
topology: v5e:2x2
jax: 0.10.0
libtpu: 0.0.40
codegen_flags: <defaults>
</compile_context>

<pallas_src>
import functools

import jax
import jax.numpy as jnp
from jax.experimental import pallas as pl
from jax.experimental.pallas import tpu as pltpu


def mlp_attention_kernel(decp_ref, enc_ref, w1e_ref, w2_ref, out_ref, *,
                         s_len, compute_dtype):
    # decp_ref : (TB, E)      dec @ W1d for this batch tile (f32, precomputed)
    # enc_ref  : (TB*S, E)    encoder states for this batch tile, flattened over S
    # w1e_ref  : (E, E)       encoder slice of W1.T   (resident)
    # w2_ref   : (1, E)       W2 row                  (resident)
    # out_ref  : (TB, E)
    TB, E = out_ref.shape
    S = s_len

    enc_flat = enc_ref[...]                                           # (TB*S, E)

    # One big MXU matmul over all TB*S rows (encoder slice of W1), f32 accumulate.
    enc_proj = jnp.dot(enc_flat, w1e_ref[...],
                       preferred_element_type=jnp.float32)            # (TB*S, E) f32

    # tanh(W1([dec; enc])): broadcast the per-batch decoder term across S.
    pre = enc_proj.reshape(TB, S, E) + decp_ref[...][:, None, :]      # f32
    h = jnp.tanh(pre.astype(compute_dtype))                           # (TB, S, E)

    # W2 scoring as VPU multiply + lane reduction, producing a lane-dense (TB, S)
    # score matrix (S on lanes) -- avoids an N=1 MXU matmul and keeps the softmax
    # below dense for long S.
    w2_row = w2_ref[...].astype(compute_dtype).reshape(1, 1, E)
    scores = jnp.sum(h * w2_row, axis=-1, dtype=jnp.float32)          # (TB, S)

    # Softmax over the source axis S (lane axis), f32 math.
    m = jnp.max(scores, axis=-1, keepdims=True)                       # (TB, 1)
    e = jnp.exp(scores - m)                                           # (TB, S)
    denom = jnp.sum(e, axis=-1, keepdims=True)                        # (TB, 1)
    p = e * pl.reciprocal(denom, approx=True)                         # (TB, S)

    # Weighted sum over S as VPU multiply + sublane reduction (avoids an M=1 MXU
    # matmul). Multiply in the encoder dtype (no full-size f32 copy of the encoder
    # tile), accumulate the S reduction in f32.
    enc3 = enc_flat.reshape(TB, S, E)
    pw = p[:, :, None].astype(enc3.dtype)                             # (TB, S, 1)
    out = jnp.sum(pw * enc3, axis=1, dtype=jnp.float32)               # (TB, E)
    out_ref[...] = out.astype(out_ref.dtype)


def _pick_tb(B, S, E, in_bytes, target_rows=1024,
             vmem_budget_bytes=40 * 1024 * 1024):
    """Pick the batch-tile size TB.

    Constraints:
      * TB divides B (exact grid).
      * TB == B or TB % 8 == 0 so (TB, E)/(TB*S, E) blocks respect sublane tiling.
      * TB*S ~ target_rows so the W1e matmul fills the MXU M dim / HBM roofline
        (measured tile-size curve: 256 rows ~63% of roofline, 512 ~85%, 1024 ~86%).
      * Double-buffered enc block plus ~4 block-sized f32 intermediates stay inside
        an explicit VMEM budget that is safe for v7x's 64 MiB physical VMEM.
      * TB <= B // 2 when B >= 16 so the "parallel" batch axis has >= 2 grid steps
        (keeps both v7x TensorCores busy; no effect on v5e/v6e).
    """
    per_row_bytes = S * E * (2 * in_bytes + 16) + 16 * E
    cap = max(1, min(target_rows // max(S, 1),
                     vmem_budget_bytes // max(per_row_bytes, 1)))
    valid = [tb for tb in range(1, B + 1)
             if B % tb == 0 and (tb == B or tb % 8 == 0)]
    if B >= 16:
        halved = [tb for tb in valid if tb <= B // 2]
        valid = halved or valid
    capped = [tb for tb in valid if tb <= cap]
    # TODO(synk): when even the smallest valid TB exceeds the budget (huge S), tile S
    # with an online-softmax accumulator instead of falling back to min(valid).
    return max(capped) if capped else min(valid)


def mlp_attention(decoder_hidden_state, encoder_states, w1, w2,
                  tb=None, matmul_dtype=None):
    """decoder_hidden_state: (1, B, D); encoder_states: (B, S, E);
    w1: (E, D+E) [PyTorch Linear weight]; w2: (1, E). Returns (B, 1, E).

    matmul_dtype: optional dtype (e.g. jnp.bfloat16) for the MXU operands and the
    encoder DMA. Default None keeps the input dtype (exact for f32 inputs)."""
    one, B, D = decoder_hidden_state.shape
    Bs, S, E = encoder_states.shape
    assert one == 1 and B == Bs
    assert w1.shape == (E, D + E) and w2.shape == (1, E)

    out_dtype = encoder_states.dtype
    op_dtype = (jnp.dtype(matmul_dtype) if matmul_dtype is not None
                else jnp.dtype(encoder_states.dtype))
    # EUP/VPU math dtype inside the kernel: low precision only when the MXU path is
    # already low precision (v6e/v7x benefit; keep f32 inputs on v5e).
    compute_dtype = (jnp.dtype(jnp.float32)
                     if op_dtype == jnp.dtype(jnp.float32) else op_dtype)

    TB = _pick_tb(B, S, E, op_dtype.itemsize) if tb is None else tb
    assert B % TB == 0

    # (1, B, D) -> (B, D): leading dim is 1, so this is a free reshape
    # (equivalent to the PyTorch permute(1, 0, 2) + squeeze of the seq dim).
    dec = decoder_hidden_state.reshape(B, D)

    # Pre-slice W1 before transposing so XLA never materializes the full W1.T.
    w1d = w1[:, :D].T.astype(op_dtype)        # (D, E)  decoder slice
    w1e = w1[:, D:].T.astype(op_dtype)        # (E, E)  encoder slice
    w2f = w2.astype(jnp.float32)              # (1, E)  cast to compute dtype in-kernel

    # Decoder projection hoisted out of the kernel: one (B, D) @ (D, E) matmul.
    dec_proj = jnp.dot(dec.astype(op_dtype), w1d,
                       preferred_element_type=jnp.float32)             # (B, E) f32

    # Flatten (B, S, E) -> (B*S, E): row b*S + s, so a (TB*S, E) block covers
    # exactly the TB batch elements of this grid step.
    enc_flat = encoder_states.reshape(B * S, E).astype(op_dtype)

    # Explicit VMEM budget: double-buffered blocks + ~4 block-sized f32
    # intermediates, clamped so it stays inside v7x's 64 MiB physical VMEM.
    block_bytes = (TB * S * E * op_dtype.itemsize            # enc tile
                   + TB * E * 4                              # dec_proj tile (f32)
                   + TB * E * jnp.dtype(out_dtype).itemsize  # out tile
                   + E * E * op_dtype.itemsize               # W1e (resident)
                   + E * 4)                                  # W2 row
    interm_bytes = 4 * TB * S * E * 4
    vmem_limit = int(min(max(2 * (2 * block_bytes + interm_bytes),
                             32 * 1024 * 1024),
                         60 * 1024 * 1024))

    kernel = functools.partial(mlp_attention_kernel,
                               s_len=S, compute_dtype=compute_dtype)

    out2d = pl.pallas_call(
        kernel,
        out_shape=jax.ShapeDtypeStruct((B, E), out_dtype),
        grid_spec=pltpu.PrefetchScalarGridSpec(
            num_scalar_prefetch=0,
            grid=(B // TB,),
            in_specs=[
                pl.BlockSpec((TB, E), lambda i: (i, 0)),        # dec_proj tile
                pl.BlockSpec((TB * S, E), lambda i: (i, 0)),    # enc tile (flat)
                # TODO(synk): pipeline_mode=pl.Buffered(1) on the constant-index
                # weight blocks would save one resident buffer each (v7x headroom).
                pl.BlockSpec((E, E), lambda i: (0, 0)),         # W1e (resident)
                pl.BlockSpec((1, E), lambda i: (0, 0)),         # W2 row (resident)
            ],
            # TODO(synk): when E is not a multiple of 128, a lane-dense
            # (B*E//128, 128) output layout would avoid masked vst.msk stores.
            out_specs=pl.BlockSpec((TB, E), lambda i: (i, 0)),
        ),
        compiler_params=pltpu.CompilerParams(
            dimension_semantics=("parallel",),
            vmem_limit_bytes=vmem_limit,
        ),
    )(dec_proj, enc_flat, w1e, w2f)

    return out2d.reshape(B, 1, E)


def _reference(decoder_hidden_state, encoder_states, w1, w2):
    dec = jnp.transpose(decoder_hidden_state, (1, 0, 2))          # (B, 1, D)
    S = encoder_states.shape[1]
    dec_exp = jnp.broadcast_to(dec, (dec.shape[0], S, dec.shape[2]))
    cat = jnp.concatenate([dec_exp, encoder_states], axis=2)      # (B, S, D+E)
    h = jnp.tanh(cat @ w1.T)                                      # (B, S, E)
    scores = (h @ w2.T)[..., 0]                                   # (B, S)
    p = jax.nn.softmax(scores, axis=1)[..., None]                 # (B, S, 1)
    return jnp.sum(p * encoder_states, axis=1, keepdims=True)     # (B, 1, E)


if __name__ == "__main__":
    B, S = 2, 8
    D = 32   # decoder_hidden_dim
    E = 32   # encoder_dim

    key = jax.random.PRNGKey(0)
    k1, k2, k3, k4 = jax.random.split(key, 4)

    decoder_hidden_state = jax.random.normal(k1, (1, B, D), dtype=jnp.float32)
    encoder_states = jax.random.normal(k2, (B, S, E), dtype=jnp.float32)

    # Deterministic "Linear" weights (Kaiming-uniform-ish scale, no bias).
    bound1 = 1.0 / jnp.sqrt(D + E)
    bound2 = 1.0 / jnp.sqrt(E)
    w1 = jax.random.uniform(k3, (E, D + E), jnp.float32, -bound1, bound1)
    w2 = jax.random.uniform(k4, (1, E), jnp.float32, -bound2, bound2)

    ref = _reference(decoder_hidden_state, encoder_states, w1, w2)

    # Default path: keeps the f32 input dtype on the MXU (exact apart from the
    # approx=True softmax reciprocal, ~1e-4 relative -> relaxed 1e-3 tolerance).
    out = mlp_attention(decoder_hidden_state, encoder_states, w1, w2)
    out = jax.block_until_ready(out)
    assert out.shape == (B, 1, E)
    assert jnp.allclose(out, ref, atol=1e-3, rtol=1e-3)

    # Optional bf16 MXU path (halves encoder DMA / W1e VMEM; precision trade-off).
    out_bf16 = mlp_attention(decoder_hidden_state, encoder_states, w1, w2,
                             matmul_dtype=jnp.bfloat16)
    out_bf16 = jax.block_until_ready(out_bf16)
    assert out_bf16.shape == (B, 1, E)
    assert jnp.allclose(out_bf16, ref, atol=1e-1, rtol=1e-1)

    print("KERNEL_OK")
</pallas_src>

<mosaic_0001>
module attributes {stable_mosaic.version = 11 : i64} {
  func.func @mlp_attention_kernel(%arg0: i32, %arg1: memref<2x32xf32, #tpu.memory_space<vmem>>, %arg2: memref<16x32xf32, #tpu.memory_space<vmem>>, %arg3: memref<32x32xf32, #tpu.memory_space<vmem>>, %arg4: memref<1x32xf32, #tpu.memory_space<vmem>>, %arg5: memref<2x32xf32, #tpu.memory_space<vmem>>) attributes {dimension_semantics = [#tpu.dimension_semantics<parallel>], iteration_bounds = array<i64: 1>, scalar_prefetch = 0 : i64, scratch_operands = 0 : i64, tpu.core_type = #tpu.core_type<tc>, window_params = [{transform_indices = @transform_0, window_bounds = array<i64: 2, 32>}, {transform_indices = @transform_1, window_bounds = array<i64: 16, 32>}, {pipeline_mode = #tpu.pipeline_mode<synchronous>, transform_indices = @transform_2, window_bounds = array<i64: 32, 32>}, {pipeline_mode = #tpu.pipeline_mode<synchronous>, transform_indices = @transform_3, window_bounds = array<i64: 1, 32>}, {transform_indices = @transform_4, window_bounds = array<i64: 2, 32>}]} {
    %c0 = arith.constant 0 : index
    %c0_0 = arith.constant 0 : index
    %0 = vector.load %arg2[%c0, %c0_0] : memref<16x32xf32, #tpu.memory_space<vmem>>, vector<16x32xf32>
    %c0_1 = arith.constant 0 : index
    %c0_2 = arith.constant 0 : index
    %1 = vector.load %arg3[%c0_1, %c0_2] : memref<32x32xf32, #tpu.memory_space<vmem>>, vector<32x32xf32>
    %cst = arith.constant dense<0.000000e+00> : vector<16x32xf32>
    %2 = tpu.matmul %0, %1, %cst {dimension_numbers = #tpu.dot_dimension_numbers<[1], [0], [0], [1], [0, 0, 1, 1], [], []>} : vector<16x32xf32>, vector<32x32xf32>, vector<16x32xf32> -> vector<16x32xf32>
    %3 = vector.shape_cast %2 : vector<16x32xf32> to vector<2x8x32xf32>
    %c0_3 = arith.constant 0 : index
    %c0_4 = arith.constant 0 : index
    %4 = vector.load %arg1[%c0_3, %c0_4] : memref<2x32xf32, #tpu.memory_space<vmem>>, vector<2x32xf32>
    %5 = vector.shape_cast %4 : vector<2x32xf32> to vector<2x1x32xf32>
    %6 = vector.broadcast %5 : vector<2x1x32xf32> to vector<2x8x32xf32>
    %7 = arith.addf %3, %6 : vector<2x8x32xf32>
    %8 = math.tanh %7 : vector<2x8x32xf32>
    %c0_5 = arith.constant 0 : index
    %c0_6 = arith.constant 0 : index
    %9 = vector.load %arg4[%c0_5, %c0_6] : memref<1x32xf32, #tpu.memory_space<vmem>>, vector<1x32xf32>
    %10 = vector.shape_cast %9 : vector<1x32xf32> to vector<1x1x32xf32>
    %11 = vector.broadcast %10 : vector<1x1x32xf32> to vector<2x8x32xf32>
    %12 = arith.mulf %8, %11 : vector<2x8x32xf32>
    %cst_7 = arith.constant dense<0.000000e+00> : vector<2x8xf32>
    %13 = vector.multi_reduction <add>, %12, %cst_7 [2] : vector<2x8x32xf32> to vector<2x8xf32>
    %cst_8 = arith.constant dense<0xFF800000> : vector<2xf32>
    %14 = vector.multi_reduction <maximumf>, %13, %cst_8 [1] : vector<2x8xf32> to vector<2xf32>
    %15 = vector.shape_cast %14 : vector<2xf32> to vector<2x1xf32>
    %16 = vector.broadcast %15 : vector<2x1xf32> to vector<2x8xf32>
    %17 = arith.subf %13, %16 : vector<2x8xf32>
    %18 = math.exp %17 : vector<2x8xf32>
    %cst_9 = arith.constant dense<0.000000e+00> : vector<2xf32>
    %19 = vector.multi_reduction <add>, %18, %cst_9 [1] : vector<2x8xf32> to vector<2xf32>
    %20 = vector.shape_cast %19 : vector<2xf32> to vector<2x1xf32>
    %21 = tpu.reciprocal %20 {approx = true} : vector<2x1xf32> -> vector<2x1xf32>
    %22 = vector.broadcast %21 : vector<2x1xf32> to vector<2x8xf32>
    %23 = arith.mulf %18, %22 : vector<2x8xf32>
    %24 = vector.shape_cast %0 : vector<16x32xf32> to vector<2x8x32xf32>
    %25 = vector.shape_cast %23 : vector<2x8xf32> to vector<2x8x1xf32>
    %26 = vector.broadcast %25 : vector<2x8x1xf32> to vector<2x8x32xf32>
    %27 = arith.mulf %26, %24 : vector<2x8x32xf32>
    %cst_10 = arith.constant dense<0.000000e+00> : vector<2x32xf32>
    %28 = vector.multi_reduction <add>, %27, %cst_10 [1] : vector<2x8x32xf32> to vector<2x32xf32>
    %c0_11 = arith.constant 0 : index
    %c0_12 = arith.constant 0 : index
    %29 = vector.load %arg5[%c0_11, %c0_12] : memref<2x32xf32, #tpu.memory_space<vmem>>, vector<2x32xf32>
    tpu.vector_store %arg5[%c0_11, %c0_12], %28 {strides = array<i32>} : memref<2x32xf32, #tpu.memory_space<vmem>>, vector<2x32xf32>,
    return
  }
  func.func @transform_0(%arg0: i32) -> (i32, i32) {
    %c0_i32 = arith.constant 0 : i32
    %c0_i32_0 = arith.constant 0 : i32
    return %arg0, %c0_i32 : i32, i32
  }
  func.func @transform_1(%arg0: i32) -> (i32, i32) {
    %c0_i32 = arith.constant 0 : i32
    %c0_i32_0 = arith.constant 0 : i32
    return %arg0, %c0_i32 : i32, i32
  }
  func.func @transform_2(%arg0: i32) -> (i32, i32) {
    %c0_i32 = arith.constant 0 : i32
    %c0_i32_0 = arith.constant 0 : i32
    %c0_i32_1 = arith.constant 0 : i32
    return %c0_i32, %c0_i32_0 : i32, i32
  }
  func.func @transform_3(%arg0: i32) -> (i32, i32) {
    %c0_i32 = arith.constant 0 : i32
    %c0_i32_0 = arith.constant 0 : i32
    %c0_i32_1 = arith.constant 0 : i32
    return %c0_i32, %c0_i32_0 : i32, i32
  }
  func.func @transform_4(%arg0: i32) -> (i32, i32) {
    %c0_i32 = arith.constant 0 : i32
    %c0_i32_0 = arith.constant 0 : i32
    return %arg0, %c0_i32 : i32, i32
  }
}

</mosaic_0001>

<bundles_post_ra>
// kernel: tpu_custom_call.1
= control target key start
LH: loop header
LB: loop body
LE: loop exit
PB: predicated region body
PF: predicated region fallthrough
CT: control target
= control target key end

     0   :  { %9 = vsyncpa [#allocation3], 0  ;;  %s414_s0 = inlined_call_operand.hbm [shape: f32[2,32], index: 0, kind: input, shape index: {}]   ;;  %s415_s1 = inlined_call_operand.hbm [shape: f32[16,32], index: 1, kind: input, shape index: {}]   ;;  %s416_s2 = inlined_call_operand.hbm [shape: f32[32,32], index: 2, kind: input, shape index: {}]   ;;  %s417_s3 = inlined_call_operand.vmem [shape: f32[1,32], index: 3, kind: input, shape index: {}]   ;;  %s418_s4 = inlined_call_operand.hbm [shape: f32[2,32], index: 4, kind: output, shape index: {}]  }
   0x1   :  { %10 = vsyncpa [#allocation6], 0  ;;  %s27_s17 = sshll.u32 %s415_s1, 4  ;;  %s28_s17 = int_to_ptr.hbm [resolvable:$true] %s27_s17 }
   0x2   :  { %11 = vsyncpa [#allocation4], 0  ;;  %s348_s18 = smov [#allocation5]   ;;  %s17_s22 = sshll.u32 %s414_s0, 4  ;;  %s18_s22 = int_to_ptr.hbm [resolvable:$true] %s17_s22 }
   0x3   :  { %s29_s19 = sshll.u32 %s348_s18, 4  ;;  %s349_s23 = smov 128   ;;  %s30_s19 = int_to_ptr.vmem [resolvable:$true] %s29_s19 }
   0x4   :  { %s350_s24 = smov 8   ;;  %s351_s25 = smov [#allocation2]  }
   0x5   :  { %35 = dma.hbm_to_vmem [thread:$0]  %s28_s17, 256, %s30_s19, [#allocation6], %s349_s23, %s349_s23, %s350_s24  }
   0x6   :  { %s19_s26 = sshll.u32 %s351_s25, 4  ;;  %s40_s29 = sshll.u32 %s416_s2, 4  ;;  %s20_s26 = int_to_ptr.vmem [resolvable:$true] %s19_s26  ;;  %s41_s29 = int_to_ptr.hbm [resolvable:$true] %s40_s29 }
   0x7   :  { %22 = dma.hbm_to_vmem [thread:$0]  %s18_s22, 32, %s20_s26, [#allocation3]  }
   0x8   :  { %s352_s1 = smov [#allocation7]  }
   0x9   :  { %s42_s30 = sshll.u32 %s352_s1, 4  ;;  %s43_s30 = int_to_ptr.vmem [resolvable:$true] %s42_s30 }
   0xa   :  { %48 = dma.hbm_to_vmem [thread:$0]  %s41_s29, 512, %s43_s30, [#allocation6], %s349_s23, %s349_s23, %s350_s24  }
   0xb   :  { %342 = dma.done.wait [#allocation3], 32  }
   0xc   :  { %343 = vsyncadd [#allocation3], 4294967264 }
   0xd   :  { %344 = dma.done.wait [#allocation6], 768  }
   0xe   :  { %345 = vsyncadd [#allocation6], 4294966528  ;;  %v68_v0 = vld [vmem:[#allocation7 + $0x18] sm:$0xff]  ;;  %v67_v1 = vld [vmem:[#allocation7 + $0x10] sm:$0xff]  ;;  %vm69_vm0 = vcmask 261120   ;;  %v124_v22 = vlaneseq  ;;  %vm128_vm1 = vcmask 1041409  }
   0xf   :  { %88 = vmatpush.msra.mxu0 %v68_v0  ;;  %221 = vmatpush.msra.mxu1 %v68_v0  ;;  %v66_v2 = vld [vmem:[#allocation7 + $0x8] sm:$0xff]  ;;  %v65_v3 = vld [vmem:[#allocation7] sm:$0xff]  ;;  %v389_v4 = vld [vmem:[#allocation5] sm:$0xff]  ;;  %vm131_vm2 = vcmask 58368   ;;  %v353_v29 = vmov 0   ;;  %s208_s8 = sshll.u32 %s418_s4, 4  ;;  %s209_s8 = int_to_ptr.hbm [resolvable:$true] %s208_s8 }
  0x10   :  { %v391_v5 = vld [vmem:[#allocation5 + $0x8] sm:$0xff]  ;;  %v99_v6 = vld [vmem:[#allocation2] sm:$0x3]  ;;  %v125_v23 = vand.u32 127, %v124_v22  ;;  %233 = vset.pattern.permute.xlu2 %v353_v29  ;;  %232 = vset.pattern.permute.xlu1 %v353_v29  ;;  %vm199_vm3 = vcmask 254976  }
  0x11   :  { %89 = vmatpush.msra.mxu0 %v67_v1  ;;  %222 = vmatpush.msra.mxu1 %v67_v1  ;;  %v101_v7 = vrot.slane %v99_v6, 1  ;;  %v102_v8 = vperm.slane %v99_v6, 0  ;;  %v235_v14 = vld [vmem:[%s417_s3] ss:$0 sm:$0xff]  ;;  %s354_s3 = smov [#allocation8]  }
  0x12   :  { %234 = vset.pattern.permute.xlu0 %v353_v29  ;;  %s206_s5 = sshll.u32 %s354_s3, 4  ;;  %s207_s5 = int_to_ptr.vmem [resolvable:$true] %s206_s5 }
  0x13   :  { %90 = vmatpush.msra.mxu0 %v66_v2  ;;  %223 = vmatpush.msra.mxu1 %v66_v2  ;;  %v103_v9 = vperm.slane %v101_v7, 0 }
  0x15   :  { %91 = vmatpush.msra.mxu0 %v65_v3  ;;  %224 = vmatpush.msra.mxu1 %v65_v3 }
  0x16   :  { %219 = vmatmul.msk.f32.vlgmr.msra.gmra.mxu0 %vm69_vm0, %v389_v4  ;;  %220 = vmatmul.msk.f32.vlgmr.msra.gmra.mxu1 %vm69_vm0, %v391_v5 }
  0x93   :  { %v93_v10 = vpop.f32.mrf.mxu0  ;;  %v96_v11 = vpop.f32.mrf.mxu1 }
  0x94   :  { %v106_v12 = vadd.f32 %v102_v8, %v93_v10  ;;  %v107_v13 = vadd.f32 %v103_v9, %v96_v11 }
  0x96   :  { %236 = vtanh.f32 %v106_v12 }
  0x97   :  { %238 = vtanh.f32 %v107_v13 }
  0x9c   :  { %v237_v15 = vpop.eup %236 }
  0x9d   :  { %v114_v16 = vmul.f32 %v237_v15, %v235_v14  ;;  %v239_v17 = vpop.eup %238 }
  0x9e   :  { %v115_v19 = vmul.f32 %v239_v17, %v235_v14 }
  0x9f   :  { %v116_v18 = vsel %vm69_vm0, %v114_v16, 0.0 }
  0xa0   :  { %117 = vadd.xlane.f32.xlu0 %v116_v18  ;;  %v119_v20 = vsel %vm69_vm0, %v115_v19, 0.0 }
  0xa8   :  { %120 = vadd.xlane.f32.xlu0 %v119_v20 }
 0x113   :  { %v118_v21 = vpop.xlane.xlu0 %117 }
 0x114   :  { %v126_v25 = vperm.slane %v118_v21, %v125_v23 }
 0x11b   :  { %v121_v24 = vpop.xlane.xlu0 %120 }
 0x11c   :  { %v127_v26 = vperm.slane %v121_v24, %v125_v23 }
 0x11e   :  { %v129_v27 = vsel %vm128_vm1, %v127_v26, %v126_v25 }
 0x11f   :  { %v132_v28 = vsel %vm131_vm2, %v129_v27, -inf }
 0x120   :  { %133 = vmax.xlane.f32.xlu1 %v132_v28 }
 0x193   :  { %v134_v30 = vpop.xlane.xlu1 %133 }
 0x194   :  { %v136_v31 = vperm.slane %v134_v30, 0  ;;  %v137_v32 = vperm.slane %v134_v30, 1 }
 0x196   :  { %v140_v33 = vsub.f32 %v118_v21, %v136_v31  ;;  %v141_v34 = vsub.f32 %v121_v24, %v137_v32 }
 0x198   :  { %v142_v35 = vmul.f32 1.442695, %v140_v33  ;;  %v144_v36 = vmul.f32 1.442695, %v141_v34 }
 0x19a   :  { %240 = vpow2.f32 %v142_v35 }
 0x19b   :  { %242 = vpow2.f32 %v144_v36 }
 0x1a0   :  { %v241_v37 = vpop.eup %240 }
 0x1a1   :  { %v243_v38 = vpop.eup %242  ;;  %149 = vperm.xlu1 %232, %v241_v37  }
 0x1a2   :  { %152 = vperm.xlu2 %233, %v243_v38  }
 0x1fc   :  { %v153_v39 = vpop.permute.xlu2 %152 }
 0x1fd   :  { %v155_v41 = vperm.slane %v153_v39, %v125_v23 }
 0x213   :  { %v150_v40 = vpop.permute.xlu1 %149 }
 0x214   :  { %v154_v42 = vperm.slane %v150_v40, %v125_v23 }
 0x216   :  { %v156_v43 = vsel %vm128_vm1, %v155_v41, %v154_v42 }
 0x217   :  { %v158_v44 = vsel %vm131_vm2, %v156_v43, 0.0 }
 0x218   :  { %159 = vadd.xlane.f32.xlu2 %v158_v44 }
 0x28b   :  { %v160_v45 = vpop.xlane.xlu2 %159 }
 0x28c   :  { %244 = vrcp.f32 %v160_v45 }
 0x292   :  { %v245_v46 = vpop.eup %244 }
 0x293   :  { %v164_v47 = vperm.slane %v245_v46, 1  ;;  %v163_v48 = vperm.slane %v245_v46, 0 }
 0x295   :  { %v168_v49 = vmul.f32 %v243_v38, %v164_v47  ;;  %v167_v50 = vmul.f32 %v241_v37, %v163_v48 }
 0x297   :  { %176 = vperm.xlu1 %232, %v168_v49   ;;  %171 = vperm.xlu0 %234, %v167_v50  }
 0x309   :  { %v177_v51 = vpop.permute.xlu1 %176  ;;  %v172_v52 = vpop.permute.xlu0 %171 }
 0x30a   :  { %v180_v53 = vmul.f32 %v177_v51, %v391_v5  ;;  %v179_v54 = vmul.f32 %v172_v52, %v389_v4 }
 0x30c   :  { %v188_v55 = vsel %vm69_vm0, %v180_v53, 0.0  ;;  %v181_v56 = vsel %vm69_vm0, %v179_v54, 0.0 }
 0x30d   :  { %v189_v57 = vrot.slane %v188_v55, 4  ;;  %v182_v58 = vrot.slane %v181_v56, 4 }
 0x30f   :  { %v190_v59 = vadd.f32 %v189_v57, %v188_v55  ;;  %v183_v60 = vadd.f32 %v182_v58, %v181_v56 }
 0x311   :  { %v191_v61 = vrot.slane %v190_v59, 2  ;;  %v184_v62 = vrot.slane %v183_v60, 2 }
 0x313   :  { %v192_v63 = vadd.f32 %v191_v61, %v190_v59  ;;  %v185_v0 = vadd.f32 %v184_v62, %v183_v60 }
 0x315   :  { %v193_v1 = vrot.slane %v192_v63, 1  ;;  %v186_v2 = vrot.slane %v185_v0, 1 }
 0x317   :  { %v194_v3 = vadd.f32 %v193_v1, %v192_v63  ;;  %v187_v4 = vadd.f32 %v186_v2, %v185_v0 }
 0x319   :  { %v197_v5 = vsel %vm128_vm1, %v194_v3, %v187_v4 }
 0x31a   :  { %200 = vst.msk [vmem:[#allocation8] sm:$0x3] %vm199_vm3, %v197_v5 }
 0x31b   :  { %211 = dma.vmem_to_hbm [thread:$0]  %s207_s5, 32, %s209_s8, [#allocation4]  }
 0x31c   :  { %346 = dma.done.wait [#allocation4], 32  }
 0x31d   :  { %347 = vsyncadd [#allocation4], 4294967264 }
 0x31e   :  { %216 = vsyncpa [#allocation3], 1 }
 0x31f   :  { %217 = vsyncpa [#allocation6], 1 }
 0x320   :  { %218 = vsyncpa [#allocation4], 1 }

</bundles_post_ra>
